<compile_context>
chip_gen: v7x
topology: tpu7x:2x2x1
jax: 0.10.0
libtpu: 0.0.40
codegen_flags: <defaults>
</compile_context>

<pallas_src>
import jax
import jax.numpy as jnp
import numpy as np
from jax.experimental import pallas as pl
from jax.experimental.pallas import tpu as pltpu

# ---- synthetic inner-model dimensions -------------------------------------
N, C, H, W = 2, 4, 16, 16        # batch, in-channels, spatial
HW = H * W
F = 32                           # hidden channels (conv1x1 out)
K = 10                           # number of output classes ("outs")

_FLOPS = 2 * N * C * F * HW + 3 * N * F * HW + 2 * N * F * K
_BYTES = 4 * (N * C * HW + C * F + F + F * K + K + N * K)


def _predict_kernel(x_ref, w1p_ref, b1_ref, w2_ref, b2_ref, out_ref):
    # x_ref:   (N, C, HW)  whole batch, lane axis = HW (lane dense)
    # w1p_ref: (C, F, 1)   conv1x1 weight, one (F, 1) column per input channel
    # b1_ref:  (1, F, 1)   hidden bias
    # w2_ref:  (F, K)      raw head weight
    # b2_ref:  (1, K)      raw head bias
    # out_ref: (N, K)      logits written directly
    x = x_ref[...]                                          # (N, C, HW) f32

    # Channel mix on the VPU: C=4 statically-unrolled multiply-adds.
    # (F,1) column lane-broadcasts over HW; (N,1,HW) channel image
    # sublane-broadcasts over F.  Accumulator starts at the bias so the
    # bias-add is fused in.  All f32 (v5e VPU has no bf16).
    acc = jnp.broadcast_to(b1_ref[...], (N, F, HW))
    for c in range(C):                                      # static unroll
        acc = acc + w1p_ref[c] * x[:, c:c + 1, :]
    h = jnp.maximum(acc, 0.0)                               # ReLU   (N, F, HW)

    # Global average pool: lane-axis sum (XLU slot is idle here) + one VPU
    # scale by 1/HW on a single vreg.
    pooled = jnp.sum(h, axis=2) * (1.0 / HW)                # (N, F)

    # Single MXU round trip for the head.
    logits = jnp.dot(pooled, w2_ref[...],
                     preferred_element_type=jnp.float32)    # (N, K)
    out_ref[...] = (logits + b2_ref[...]).astype(out_ref.dtype)


def prepare_params(w1, b1, w2, b2):
    """One-time parameter packing (setup time, NOT on the per-call path)."""
    w1p = jnp.asarray(w1, jnp.float32).reshape(C, F, 1)
    b1p = jnp.asarray(b1, jnp.float32).reshape(1, F, 1)
    w2p = jnp.asarray(w2, jnp.float32)                 # (F, K) raw
    b2p = jnp.asarray(b2, jnp.float32).reshape(1, K)
    return w1p, b1p, w2p, b2p


@jax.jit
def prediction_wrapper_forward(x_nchw, w1p, b1p, w2p, b2p):
    """Equivalent of PredictionWrapper(model)(x): returns only `outs`."""
    x_r = x_nchw.reshape(N, C, HW)   # free contiguous reshape of NCHW
    vmem = pl.BlockSpec(memory_space=pltpu.MemorySpace.VMEM)
    return pl.pallas_call(
        _predict_kernel,
        out_shape=jax.ShapeDtypeStruct((N, K), jnp.float32),
        in_specs=[vmem, vmem, vmem, vmem, vmem],
        out_specs=vmem,
        cost_estimate=pl.CostEstimate(
            flops=_FLOPS, transcendentals=0, bytes_accessed=_BYTES),
    )(x_r, w1p, b1p, w2p, b2p)


if __name__ == "__main__":
    key = jax.random.PRNGKey(0)
    kx, k1, kb1, k2, kb2 = jax.random.split(key, 5)

    # deterministic example input + parameters
    x = jax.random.normal(kx, (N, C, H, W), dtype=jnp.float32)
    w1 = jax.random.normal(k1, (C, F), dtype=jnp.float32) * 0.1
    b1 = jax.random.normal(kb1, (F,), dtype=jnp.float32) * 0.01
    w2 = jax.random.normal(k2, (F, K), dtype=jnp.float32) * 0.1
    b2 = jax.random.normal(kb2, (K,), dtype=jnp.float32) * 0.01

    # pack once at setup time; only x + prepacked params cross the jit boundary
    params = prepare_params(w1, b1, w2, b2)
    params = jax.block_until_ready(params)

    outs = prediction_wrapper_forward(x, *params)
    outs = jax.block_until_ready(outs)

    # pure-JAX reference of the same inner model (wrapper discards features)
    x_nsc = jnp.transpose(x, (0, 2, 3, 1)).reshape(N, HW, C)
    feats_ref = jnp.maximum(jnp.einsum("nsc,cf->nsf", x_nsc, w1) + b1, 0.0)
    pooled_ref = jnp.mean(feats_ref, axis=1)
    outs_ref = pooled_ref @ w2 + b2

    np.testing.assert_allclose(np.asarray(outs), np.asarray(outs_ref),
                               rtol=1e-5, atol=1e-5)
    print("KERNEL_OK")
</pallas_src>

<mosaic_0001>
module attributes {stable_mosaic.version = 11 : i64} {
  func.func @_predict_kernel(%arg0: memref<2x4x256xf32, #tpu.memory_space<vmem>>, %arg1: memref<4x32x1xf32, #tpu.memory_space<vmem>>, %arg2: memref<1x32x1xf32, #tpu.memory_space<vmem>>, %arg3: memref<32x10xf32, #tpu.memory_space<vmem>>, %arg4: memref<1x10xf32, #tpu.memory_space<vmem>>, %arg5: memref<2x10xf32, #tpu.memory_space<vmem>>) attributes {dimension_semantics = [], scalar_prefetch = 0 : i64, scratch_operands = 0 : i64, tpu.core_type = #tpu.core_type<tc>} {
    %c0 = arith.constant 0 : index
    %c0_0 = arith.constant 0 : index
    %c0_1 = arith.constant 0 : index
    %0 = vector.load %arg0[%c0, %c0_0, %c0_1] : memref<2x4x256xf32, #tpu.memory_space<vmem>>, vector<2x4x256xf32>
    %c0_2 = arith.constant 0 : index
    %c0_3 = arith.constant 0 : index
    %c0_4 = arith.constant 0 : index
    %1 = vector.load %arg2[%c0_2, %c0_3, %c0_4] : memref<1x32x1xf32, #tpu.memory_space<vmem>>, vector<1x32x1xf32>
    %2 = vector.shape_cast %1 : vector<1x32x1xf32> to vector<1x32x1xf32>
    %3 = vector.broadcast %2 : vector<1x32x1xf32> to vector<2x32x256xf32>
    %c0_5 = arith.constant 0 : index
    %c0_6 = arith.constant 0 : index
    %c0_7 = arith.constant 0 : index
    %4 = vector.load %arg1[%c0_5, %c0_6, %c0_7] : memref<4x32x1xf32, #tpu.memory_space<vmem>>, vector<1x32x1xf32>
    %5 = vector.shape_cast %4 : vector<1x32x1xf32> to vector<32x1xf32>
    %6 = vector.extract_strided_slice %0 {offsets = [0, 0, 0], sizes = [2, 1, 256], strides = [1, 1, 1]} : vector<2x4x256xf32> to vector<2x1x256xf32>
    %7 = vector.shape_cast %5 : vector<32x1xf32> to vector<1x32x1xf32>
    %8 = vector.broadcast %7 : vector<1x32x1xf32> to vector<2x32x256xf32>
    %9 = vector.broadcast %6 : vector<2x1x256xf32> to vector<2x32x256xf32>
    %10 = arith.mulf %8, %9 : vector<2x32x256xf32>
    %11 = arith.addf %3, %10 : vector<2x32x256xf32>
    %c1 = arith.constant 1 : index
    %c0_8 = arith.constant 0 : index
    %c0_9 = arith.constant 0 : index
    %12 = vector.load %arg1[%c1, %c0_8, %c0_9] : memref<4x32x1xf32, #tpu.memory_space<vmem>>, vector<1x32x1xf32>
    %13 = vector.shape_cast %12 : vector<1x32x1xf32> to vector<32x1xf32>
    %14 = vector.extract_strided_slice %0 {offsets = [0, 1, 0], sizes = [2, 1, 256], strides = [1, 1, 1]} : vector<2x4x256xf32> to vector<2x1x256xf32>
    %15 = vector.shape_cast %13 : vector<32x1xf32> to vector<1x32x1xf32>
    %16 = vector.broadcast %15 : vector<1x32x1xf32> to vector<2x32x256xf32>
    %17 = vector.broadcast %14 : vector<2x1x256xf32> to vector<2x32x256xf32>
    %18 = arith.mulf %16, %17 : vector<2x32x256xf32>
    %19 = arith.addf %11, %18 : vector<2x32x256xf32>
    %c2 = arith.constant 2 : index
    %c0_10 = arith.constant 0 : index
    %c0_11 = arith.constant 0 : index
    %20 = vector.load %arg1[%c2, %c0_10, %c0_11] : memref<4x32x1xf32, #tpu.memory_space<vmem>>, vector<1x32x1xf32>
    %21 = vector.shape_cast %20 : vector<1x32x1xf32> to vector<32x1xf32>
    %22 = vector.extract_strided_slice %0 {offsets = [0, 2, 0], sizes = [2, 1, 256], strides = [1, 1, 1]} : vector<2x4x256xf32> to vector<2x1x256xf32>
    %23 = vector.shape_cast %21 : vector<32x1xf32> to vector<1x32x1xf32>
    %24 = vector.broadcast %23 : vector<1x32x1xf32> to vector<2x32x256xf32>
    %25 = vector.broadcast %22 : vector<2x1x256xf32> to vector<2x32x256xf32>
    %26 = arith.mulf %24, %25 : vector<2x32x256xf32>
    %27 = arith.addf %19, %26 : vector<2x32x256xf32>
    %c3 = arith.constant 3 : index
    %c0_12 = arith.constant 0 : index
    %c0_13 = arith.constant 0 : index
    %28 = vector.load %arg1[%c3, %c0_12, %c0_13] : memref<4x32x1xf32, #tpu.memory_space<vmem>>, vector<1x32x1xf32>
    %29 = vector.shape_cast %28 : vector<1x32x1xf32> to vector<32x1xf32>
    %30 = vector.extract_strided_slice %0 {offsets = [0, 3, 0], sizes = [2, 1, 256], strides = [1, 1, 1]} : vector<2x4x256xf32> to vector<2x1x256xf32>
    %31 = vector.shape_cast %29 : vector<32x1xf32> to vector<1x32x1xf32>
    %32 = vector.broadcast %31 : vector<1x32x1xf32> to vector<2x32x256xf32>
    %33 = vector.broadcast %30 : vector<2x1x256xf32> to vector<2x32x256xf32>
    %34 = arith.mulf %32, %33 : vector<2x32x256xf32>
    %35 = arith.addf %27, %34 : vector<2x32x256xf32>
    %cst = arith.constant 0.000000e+00 : f32
    %36 = vector.broadcast %cst : f32 to vector<2x32x256xf32>
    %37 = arith.maximumf %35, %36 : vector<2x32x256xf32>
    %cst_14 = arith.constant dense<0.000000e+00> : vector<2x32xf32>
    %38 = vector.multi_reduction <add>, %37, %cst_14 [2] : vector<2x32x256xf32> to vector<2x32xf32>
    %cst_15 = arith.constant 3.906250e-03 : f32
    %39 = vector.broadcast %cst_15 : f32 to vector<2x32xf32>
    %40 = arith.mulf %38, %39 : vector<2x32xf32>
    %c0_16 = arith.constant 0 : index
    %c0_17 = arith.constant 0 : index
    %41 = vector.load %arg3[%c0_16, %c0_17] : memref<32x10xf32, #tpu.memory_space<vmem>>, vector<32x10xf32>
    %cst_18 = arith.constant dense<0.000000e+00> : vector<2x10xf32>
    %42 = tpu.matmul %40, %41, %cst_18 {dimension_numbers = #tpu.dot_dimension_numbers<[1], [0], [0], [1], [0, 0, 1, 1], [], []>} : vector<2x32xf32>, vector<32x10xf32>, vector<2x10xf32> -> vector<2x10xf32>
    %c0_19 = arith.constant 0 : index
    %c0_20 = arith.constant 0 : index
    %43 = vector.load %arg4[%c0_19, %c0_20] : memref<1x10xf32, #tpu.memory_space<vmem>>, vector<1x10xf32>
    %44 = vector.broadcast %43 : vector<1x10xf32> to vector<2x10xf32>
    %45 = arith.addf %42, %44 : vector<2x10xf32>
    %c0_21 = arith.constant 0 : index
    %c0_22 = arith.constant 0 : index
    %46 = vector.load %arg5[%c0_21, %c0_22] : memref<2x10xf32, #tpu.memory_space<vmem>>, vector<2x10xf32>
    tpu.vector_store %arg5[%c0_21, %c0_22], %45 {strides = array<i32>} : memref<2x10xf32, #tpu.memory_space<vmem>>, vector<2x10xf32>,
    return
  }
}

</mosaic_0001>

<bundles_post_ra>
// kernel: prediction_wrapper_forward.1
= control target key start
LH: loop header
LB: loop body
LE: loop exit
PB: predicated region body
PF: predicated region fallthrough
CT: control target
= control target key end

     0   :  { %v691_v2 = vmov 0   ;;  %s919_s0 = inlined_call_operand.vmem [shape: f32[2,4,256], index: 0, kind: input, shape index: {}]   ;;  %s920_s1 = inlined_call_operand.vmem [shape: f32[4,32,1], index: 1, kind: input, shape index: {}]   ;;  %s921_s2 = inlined_call_operand.vmem [shape: f32[1,32,1], index: 2, kind: input, shape index: {}]   ;;  %s922_s3 = inlined_call_operand.vmem [shape: f32[32,10], index: 3, kind: input, shape index: {}]   ;;  %s923_s4 = inlined_call_operand.vmem [shape: f32[1,10], index: 4, kind: input, shape index: {}]   ;;  %s924_s5 = inlined_call_operand.hbm [shape: f32[2,10], index: 5, kind: output, shape index: {}]  }
   0x1   :  { %v49_v0 = vld [vmem:[%s920_s1 + $0x10] sm:$0xff]  ;;  %v47_v1 = vld [vmem:[%s920_s1] sm:$0xff]  ;;  %666 = vset.pattern.permute.xlu1 %v691_v2  ;;  %665 = vset.pattern.permute.xlu0 %v691_v2  ;;  %v48_v3 = vld [vmem:[%s920_s1 + $0x8] sm:$0xff] }
   0x2   :  { %63 = vperm.xlu1 %666, %v49_v0   ;;  %53 = vperm.xlu0 %665, %v47_v1   ;;  %v23_v4 = vld [vmem:[%s921_s2] sm:$0xff]  ;;  %v24_v5 = vld [vmem:[%s921_s2 + $0x8] sm:$0xff]  ;;  %v50_v6 = vld [vmem:[%s920_s1 + $0x18] sm:$0xff] }
   0x6   :  { %58 = vperm.xlu0 %665, %v48_v3   ;;  %29 = vperm.xlu1 %666, %v23_v4  }
   0x7   :  { %10 = vsyncpa [#allocation3], 0  ;;  %v624_v7 = vld [vmem:[%s920_s1 + $0x20] sm:$0xff]  ;;  %v625_v8 = vld [vmem:[%s920_s1 + $0x28] sm:$0xff]  ;;  %v73_v21 = vlaneseq  ;;  %vm693_vm0 = vmmov 0   ;;  %vm498_vm1 = vcmask 130112  }
   0x8   :  { %v25_v9 = vld [vmem:[%s921_s2 + $0x10] sm:$0xff]  ;;  %v26_v11 = vld [vmem:[%s921_s2 + $0x18] sm:$0xff]  ;;  %v628_v13 = vld [vmem:[%s920_s1 + $0x40] sm:$0xff]  ;;  %vm505_vm2 = vcmask 195712   ;;  %vm512_vm3 = vcmask 261312   ;;  %vm533_vm4 = vcmask 1041409  }
   0x9   :  { %v626_v10 = vld [vmem:[%s920_s1 + $0x30] sm:$0xff]  ;;  %v627_v12 = vld [vmem:[%s920_s1 + $0x38] sm:$0xff]  ;;  %v629_v14 = vld [vmem:[%s920_s1 + $0x48] sm:$0xff]  ;;  %v787_v22 = vshrl.u32 %v73_v21, 7  ;;  %vm535_vm5 = vcmask 261120   ;;  %s695_s18 = smov [#allocation2]  }
   0xa   :  { %34 = vperm.xlu0 %665, %v24_v5   ;;  %68 = vperm.xlu1 %666, %v50_v6   ;;  %v630_v15 = vld [vmem:[%s920_s1 + $0x50] sm:$0xff]  ;;  %v631_v16 = vld [vmem:[%s920_s1 + $0x58] sm:$0xff]  ;;  %v632_v17 = vld [vmem:[%s920_s1 + $0x60] sm:$0xff]  ;;  %s616_s19 = sshll.u32 %s695_s18, 4  ;;  %vm608_vm6 = vcmask 74752   ;;  %s617_s19 = int_to_ptr.vmem [resolvable:$true] %s616_s19 }
   0xb   :  { %v633_v18 = vld [vmem:[%s920_s1 + $0x68] sm:$0xff]  ;;  %v634_v19 = vld [vmem:[%s920_s1 + $0x70] sm:$0xff]  ;;  %v635_v20 = vld [vmem:[%s920_s1 + $0x78] sm:$0xff]  ;;  %v75_v23 = vsub.s32 0, %v787_v22  ;;  %v79_v24 = vsub.s32 4, %v787_v22  ;;  %v168_v26 = vsub.s32 1, %v787_v22  ;;  %p672_p1 = scmp.lt.s32.totalorder %s617_s19, %s617_s19 }
   0xc   :  { %v21_v25 = vld [vmem:[%s919_s0] sm:$0xff]  ;;  %v22_v28 = vld [vmem:[%s919_s0 + $0x8] sm:$0xff]  ;;  %v172_v30 = vsub.s32 5, %v787_v22  ;;  %v261_v31 = vsub.s32 2, %v787_v22  ;;  %v265_v32 = vsub.s32 6, %v787_v22  ;;  %v354_v33 = vsub.s32 3, %v787_v22 }
   0xd   :  { %v76_v34 = vrot.slane %v21_v25, %v75_v23  ;;  %v358_v35 = vsub.s32 7, %v787_v22  ;;  %v80_v36 = vrot.slane %v21_v25, %v79_v24  ;;  %v84_v37 = vrot.slane %v22_v28, %v75_v23  ;;  %s667_s20 = scalar_lea.vmem %s617_s19, 32 }
   0xe   :  { %148 = vperm.xlu0 %665, %v624_v7   ;;  %153 = vperm.xlu1 %666, %v625_v8   ;;  %v88_v38 = vrot.slane %v22_v28, %v79_v24  ;;  %v169_v39 = vrot.slane %v21_v25, %v168_v26  ;;  %v173_v42 = vrot.slane %v21_v25, %v172_v30  ;;  %p668_p0 = scmp.ne.s32.totalorder %s617_s19, %s667_s20  ;;  %p673_p2 = scmp.lt.s32.totalorder %s667_s20, %s667_s20 }
   0xf   :  { %v177_v43 = vrot.slane %v22_v28, %v168_v26  ;;  %v181_v44 = vrot.slane %v22_v28, %v172_v30  ;;  %v262_v45 = vrot.slane %v21_v25, %v261_v31  ;;  %v266_v46 = vrot.slane %v21_v25, %v265_v32 }
  0x10   :  { %v270_v47 = vrot.slane %v22_v28, %v261_v31  ;;  %v274_v48 = vrot.slane %v22_v28, %v265_v32  ;;  %v355_v49 = vrot.slane %v21_v25, %v354_v33  ;;  %v96_v50 = vrot.slane %v76_v34, %v75_v23  ;;  %p674_p3 = por %p673_p2, %p672_p1 }
  0x11   :  { %v359_v51 = vrot.slane %v21_v25, %v358_v35  ;;  %v363_v52 = vrot.slane %v22_v28, %v354_v33  ;;  %v367_v53 = vrot.slane %v22_v28, %v358_v35  ;;  %v100_v54 = vrot.slane %v80_v36, %v75_v23 }
  0x12   :  { %39 = vperm.xlu0 %665, %v25_v9   ;;  %158 = vperm.xlu1 %666, %v626_v10   ;;  %v104_v55 = vrot.slane %v84_v37, %v75_v23  ;;  %v108_v56 = vrot.slane %v88_v38, %v75_v23  ;;  %v803_v57 = vrot.slane %v169_v39, %v168_v26  ;;  %p675_p4 = pnand %p674_p3, %p668_p0 }
  0x13   :  { %v805_v60 = vrot.slane %v173_v42, %v168_v26  ;;  %v807_v61 = vrot.slane %v177_v43, %v168_v26  ;;  %v809_v62 = vrot.slane %v181_v44, %v168_v26  ;;  %v811_v63 = vrot.slane %v262_v45, %v261_v31 }
  0x14   :  { %v813_v0 = vrot.slane %v266_v46, %v261_v31  ;;  %v815_v1 = vrot.slane %v270_v47, %v261_v31  ;;  %v817_v2 = vrot.slane %v274_v48, %v261_v31  ;;  %v819_v3 = vrot.slane %v355_v49, %v354_v33 }
  0x15   :  { %v821_v5 = vrot.slane %v359_v51, %v354_v33  ;;  %v823_v6 = vrot.slane %v363_v52, %v354_v33  ;;  %v825_v7 = vrot.slane %v367_v53, %v354_v33 }
  0x16   :  { %44 = vperm.xlu0 %665, %v26_v11   ;;  %163 = vperm.xlu1 %666, %v627_v12  }
  0x1a   :  { %241 = vperm.xlu0 %665, %v628_v13   ;;  %246 = vperm.xlu1 %666, %v629_v14  }
  0x1e   :  { %251 = vperm.xlu0 %665, %v630_v15   ;;  %256 = vperm.xlu1 %666, %v631_v16  }
  0x22   :  { %334 = vperm.xlu0 %665, %v632_v17   ;;  %339 = vperm.xlu1 %666, %v633_v18  }
  0x26   :  { %344 = vperm.xlu0 %665, %v634_v19   ;;  %349 = vperm.xlu1 %666, %v635_v20  }
  0x81   :  { %v64_v27 = vpop.permute.xlu1 %63  ;;  %v54_v29 = vpop.permute.xlu0 %53 }
  0x82   :  { %v113_v4 = vmul.f32 %v96_v50, %v64_v27  ;;  %v114_v8 = vmul.f32 %v100_v54, %v64_v27  ;;  %v121_v9 = vmul.f32 %v104_v55, %v64_v27  ;;  %v122_v10 = vmul.f32 %v108_v56, %v64_v27 }
  0x83   :  { %v109_v11 = vmul.f32 %v96_v50, %v54_v29  ;;  %v110_v12 = vmul.f32 %v100_v54, %v54_v29  ;;  %v117_v13 = vmul.f32 %v104_v55, %v54_v29  ;;  %v118_v14 = vmul.f32 %v108_v56, %v54_v29 }
  0x85   :  { %v59_v40 = vpop.permute.xlu0 %58  ;;  %v30_v41 = vpop.permute.xlu1 %29 }
  0x86   :  { %v111_v15 = vmul.f32 %v96_v50, %v59_v40  ;;  %v112_v18 = vmul.f32 %v100_v54, %v59_v40  ;;  %v119_v19 = vmul.f32 %v104_v55, %v59_v40  ;;  %v120_v20 = vmul.f32 %v108_v56, %v59_v40 }
  0x87   :  { %v125_v23 = vadd.f32 %v109_v11, %v30_v41  ;;  %v126_v24 = vadd.f32 %v110_v12, %v30_v41  ;;  %v133_v25 = vadd.f32 %v117_v13, %v30_v41  ;;  %v134_v26 = vadd.f32 %v118_v14, %v30_v41 }
  0x89   :  { %v35_v58 = vpop.permute.xlu0 %34  ;;  %v69_v59 = vpop.permute.xlu1 %68 }
  0x8a   :  { %v127_v28 = vadd.f32 %v111_v15, %v35_v58  ;;  %v128_v30 = vadd.f32 %v112_v18, %v35_v58  ;;  %v135_v38 = vadd.f32 %v119_v19, %v35_v58  ;;  %v136_v39 = vadd.f32 %v120_v20, %v35_v58 }
  0x8b   :  { %v115_v40 = vmul.f32 %v96_v50, %v69_v59  ;;  %v116_v42 = vmul.f32 %v100_v54, %v69_v59  ;;  %v123_v43 = vmul.f32 %v104_v55, %v69_v59  ;;  %v124_v46 = vmul.f32 %v108_v56, %v69_v59 }
  0x8d   :  { %v149_v16 = vpop.permute.xlu0 %148  ;;  %v154_v17 = vpop.permute.xlu1 %153 }
  0x8e   :  { %v202_v31 = vmul.f32 %v803_v57, %v149_v16  ;;  %v203_v27 = vmul.f32 %v805_v60, %v149_v16  ;;  %v210_v32 = vmul.f32 %v807_v61, %v149_v16  ;;  %v211_v29 = vmul.f32 %v809_v62, %v149_v16 }
  0x8f   :  { %v204_v33 = vmul.f32 %v803_v57, %v154_v17  ;;  %v205_v34 = vmul.f32 %v805_v60, %v154_v17  ;;  %v212_v35 = vmul.f32 %v807_v61, %v154_v17  ;;  %v213_v41 = vmul.f32 %v809_v62, %v154_v17 }
  0x90   :  { %v218_v47 = vadd.f32 %v202_v31, %v125_v23  ;;  %v219_v48 = vadd.f32 %v203_v27, %v126_v24  ;;  %v226_v49 = vadd.f32 %v210_v32, %v133_v25  ;;  %v227_v51 = vadd.f32 %v211_v29, %v134_v26 }
  0x91   :  { %v40_v36 = vpop.permute.xlu0 %39  ;;  %v159_v37 = vpop.permute.xlu1 %158  ;;  %v220_v52 = vadd.f32 %v204_v33, %v127_v28  ;;  %v221_v53 = vadd.f32 %v205_v34, %v128_v30  ;;  %v228_v11 = vadd.f32 %v212_v35, %v135_v38  ;;  %v229_v14 = vadd.f32 %v213_v41, %v136_v39 }
  0x92   :  { %v129_v44 = vadd.f32 %v113_v4, %v40_v36  ;;  %v206_v45 = vmul.f32 %v803_v57, %v159_v37  ;;  %v130_v58 = vadd.f32 %v114_v8, %v40_v36  ;;  %v137_v50 = vadd.f32 %v121_v9, %v40_v36 }
  0x93   :  { %v207_v15 = vmul.f32 %v805_v60, %v159_v37  ;;  %v138_v54 = vadd.f32 %v122_v10, %v40_v36  ;;  %v214_v55 = vmul.f32 %v807_v61, %v159_v37  ;;  %v215_v4 = vmul.f32 %v809_v62, %v159_v37 }
  0x94   :  { %v222_v56 = vadd.f32 %v206_v45, %v129_v44 }
  0x95   :  { %v45_v12 = vpop.permute.xlu0 %44  ;;  %v164_v13 = vpop.permute.xlu1 %163  ;;  %v223_v10 = vadd.f32 %v207_v15, %v130_v58 }
  0x96   :  { %v131_v59 = vadd.f32 %v115_v40, %v45_v12  ;;  %v132_v16 = vadd.f32 %v116_v42, %v45_v12  ;;  %v139_v17 = vadd.f32 %v123_v43, %v45_v12  ;;  %v208_v18 = vmul.f32 %v803_v57, %v164_v13 }
  0x97   :  { %v140_v19 = vadd.f32 %v124_v46, %v45_v12  ;;  %v209_v20 = vmul.f32 %v805_v60, %v164_v13  ;;  %v216_v23 = vmul.f32 %v807_v61, %v164_v13  ;;  %v217_v8 = vmul.f32 %v809_v62, %v164_v13 }
  0x98   :  { %v850_v61 = vadd.f32 %v214_v55, %v137_v50  ;;  %v852_v62 = vadd.f32 %v215_v4, %v138_v54  ;;  %v224_v27 = vadd.f32 %v208_v18, %v131_v59 }
  0x99   :  { %v242_v9 = vpop.permute.xlu0 %241  ;;  %v247_v24 = vpop.permute.xlu1 %246  ;;  %v225_v29 = vadd.f32 %v209_v20, %v132_v16  ;;  %v855_v33 = vadd.f32 %v216_v23, %v139_v17  ;;  %v857_v34 = vadd.f32 %v217_v8, %v140_v19 }
  0x9a   :  { %v295_v25 = vmul.f32 %v811_v63, %v242_v9  ;;  %v296_v26 = vmul.f32 %v813_v0, %v242_v9  ;;  %v303_v28 = vmul.f32 %v815_v1, %v242_v9  ;;  %v304_v30 = vmul.f32 %v817_v2, %v242_v9 }
  0x9b   :  { %v297_v57 = vmul.f32 %v811_v63, %v247_v24  ;;  %v298_v31 = vmul.f32 %v813_v0, %v247_v24  ;;  %v305_v60 = vmul.f32 %v815_v1, %v247_v24  ;;  %v306_v32 = vmul.f32 %v817_v2, %v247_v24 }
  0x9c   :  { %v311_v37 = vadd.f32 %v295_v25, %v218_v47  ;;  %v312_v40 = vadd.f32 %v296_v26, %v219_v48  ;;  %v319_v41 = vadd.f32 %v303_v28, %v226_v49  ;;  %v320_v44 = vadd.f32 %v304_v30, %v227_v51 }
  0x9d   :  { %v252_v35 = vpop.permute.xlu0 %251  ;;  %v257_v36 = vpop.permute.xlu1 %256  ;;  %v313_v42 = vadd.f32 %v297_v57, %v220_v52  ;;  %v314_v43 = vadd.f32 %v298_v31, %v221_v53  ;;  %v321_v45 = vadd.f32 %v305_v60, %v228_v11  ;;  %v322_v58 = vadd.f32 %v306_v32, %v229_v14 }
  0x9e   :  { %v299_v38 = vmul.f32 %v811_v63, %v252_v35  ;;  %v300_v39 = vmul.f32 %v813_v0, %v252_v35  ;;  %v307_v46 = vmul.f32 %v815_v1, %v252_v35  ;;  %v301_v12 = vmul.f32 %v811_v63, %v257_v36 }
  0x9f   :  { %v302_v13 = vmul.f32 %v813_v0, %v257_v36  ;;  %v308_v50 = vmul.f32 %v817_v2, %v252_v35  ;;  %v309_v47 = vmul.f32 %v815_v1, %v257_v36 }
  0xa0   :  { %v315_v55 = vadd.f32 %v299_v38, %v222_v56  ;;  %v316_v48 = vadd.f32 %v300_v39, %v223_v10  ;;  %v317_v56 = vadd.f32 %v301_v12, %v224_v27 }
  0xa1   :  { %v335_v15 = vpop.permute.xlu0 %334  ;;  %v340_v54 = vpop.permute.xlu1 %339  ;;  %v318_v59 = vadd.f32 %v302_v13, %v225_v29  ;;  %v324_v12 = vadd.f32 %v308_v50, %v852_v62 }
  0xa2   :  { %v388_v49 = vmul.f32 %v819_v3, %v335_v15  ;;  %v389_v51 = vmul.f32 %v821_v5, %v335_v15  ;;  %v396_v52 = vmul.f32 %v823_v6, %v335_v15  ;;  %v397_v53 = vmul.f32 %v825_v7, %v335_v15 }
  0xa3   :  { %v390_v63 = vmul.f32 %v819_v3, %v340_v54  ;;  %v391_v0 = vmul.f32 %v821_v5, %v340_v54  ;;  %v398_v11 = vmul.f32 %v823_v6, %v340_v54  ;;  %v399_v1 = vmul.f32 %v825_v7, %v340_v54 }
  0xa4   :  { %v404_v14 = vadd.f32 %v388_v49, %v311_v37  ;;  %v405_v4 = vadd.f32 %v389_v51, %v312_v40  ;;  %v412_v20 = vadd.f32 %v396_v52, %v319_v41  ;;  %v413_v23 = vadd.f32 %v397_v53, %v320_v44 }
  0xa5   :  { %v345_v16 = vpop.permute.xlu0 %344  ;;  %v350_v17 = vpop.permute.xlu1 %349  ;;  %v406_v18 = vadd.f32 %v390_v63, %v313_v42  ;;  %v407_v19 = vadd.f32 %v391_v0, %v314_v43  ;;  %v414_v24 = vadd.f32 %v398_v11, %v321_v45  ;;  %v415_v10 = vadd.f32 %v399_v1, %v322_v58  ;;  %v470_v1 = vld [vmem:[%s922_s3 + $0x10] sm:$0xff] }
  0xa6   :  { %v392_v8 = vmul.f32 %v819_v3, %v345_v16  ;;  %v393_v9 = vmul.f32 %v821_v5, %v345_v16  ;;  %v400_v25 = vmul.f32 %v823_v6, %v345_v16  ;;  %v401_v26 = vmul.f32 %v825_v7, %v345_v16 }
  0xa7   :  { %v394_v28 = vmul.f32 %v819_v3, %v350_v17  ;;  %v395_v30 = vmul.f32 %v821_v5, %v350_v17  ;;  %v422_v57 = vmax.f32 %v406_v18, 0.0  ;;  %v423_v31 = vmax.f32 %v407_v19, 0.0 }
  0xa8   :  { %v420_v60 = vmax.f32 %v404_v14, 0.0  ;;  %v421_v27 = vmax.f32 %v405_v4, 0.0  ;;  %v408_v32 = vadd.f32 %v392_v8, %v315_v55  ;;  %v409_v29 = vadd.f32 %v393_v9, %v316_v48  ;;  %v471_v14 = vld [vmem:[%s922_s3 + $0x18] sm:$0xff] }
  0xa9   :  { %v428_v35 = vmax.f32 %v412_v20, 0.0  ;;  %v429_v37 = vmax.f32 %v413_v23, 0.0  ;;  %v439_v38 = vadd.f32 %v423_v31, %v422_v57  ;;  %v410_v40 = vadd.f32 %v394_v28, %v317_v56 }
  0xaa   :  { %v436_v39 = vadd.f32 %v421_v27, %v420_v60  ;;  %v411_v41 = vadd.f32 %v395_v30, %v318_v59  ;;  %v310_v42 = vmul.f32 %v817_v2, %v257_v36  ;;  %v424_v43 = vmax.f32 %v408_v32, 0.0 }
  0xab   :  { %v425_v44 = vmax.f32 %v409_v29, 0.0  ;;  %v323_v3 = vadd.f32 %v307_v46, %v850_v61  ;;  %v402_v5 = vmul.f32 %v823_v6, %v350_v17  ;;  %v403_v45 = vmul.f32 %v825_v7, %v350_v17  ;;  %440 = vadd.xlane.f32.xlu1 %v439_v38 }
  0xac   :  { %437 = vadd.xlane.f32.xlu0 %v436_v39  ;;  %v448_v58 = vadd.f32 %v429_v37, %v428_v35  ;;  %v426_v15 = vmax.f32 %v410_v40, 0.0  ;;  %v430_v54 = vmax.f32 %v414_v24, 0.0  ;;  %v427_v55 = vmax.f32 %v411_v41, 0.0 }
  0xad   :  { %v442_v13 = vadd.f32 %v425_v44, %v424_v43  ;;  %v431_v48 = vmax.f32 %v415_v10, 0.0  ;;  %v416_v49 = vadd.f32 %v400_v25, %v323_v3  ;;  %v417_v2 = vadd.f32 %v401_v26, %v324_v12 }
  0xae   :  { %v325_v36 = vadd.f32 %v309_v47, %v855_v33  ;;  %v326_v61 = vadd.f32 %v310_v42, %v857_v34  ;;  %v445_v46 = vadd.f32 %v427_v55, %v426_v15  ;;  %v468_v33 = vld [vmem:[%s922_s3] sm:$0xff]  ;;  %v469_v34 = vld [vmem:[%s922_s3 + $0x8] sm:$0xff]  ;;  %v692_v47 = vmov 0.0|0.0  }
  0xaf   :  { %443 = vadd.xlane.f32.xlu1 %v442_v13  ;;  %v451_v51 = vadd.f32 %v431_v48, %v430_v54  ;;  %v432_v52 = vmax.f32 %v416_v49, 0.0  ;;  %v433_v62 = vmax.f32 %v417_v2, 0.0  ;;  %654 = vmatprep.subr.bf16.mxu0 %v692_v47  ;;  %v655_v11 = vpack.c.bf16 %v469_v34, %v468_v33  ;;  %v636_v54 = vld [vmem:[%s923_s4] ss:$0 sm:$0xff] }
  0xb0   :  { %449 = vadd.xlane.f32.xlu0 %v448_v58  ;;  %v418_v6 = vadd.f32 %v402_v5, %v325_v36  ;;  %v419_v7 = vadd.f32 %v403_v45, %v326_v61  ;;  %v658_v4 = vpack.c.bf16 %v471_v14, %v470_v1  ;;  %v694_v56 = vmov 0.0  }
  0xb1   :  { %v454_v50 = vadd.f32 %v433_v62, %v432_v52  ;;  %656 = vmatpush3.bf16.msra.mxu0 %v655_v11  ;;  %651 = vmatprep.mubr.msk.f32.mxu0 %vm693_vm0, %v694_v56  ;;  %v488_v17 = vand.u32 127, %v73_v21 }
  0xb2   :  { %v434_v53 = vmax.f32 %v418_v6, 0.0  ;;  %v435_v63 = vmax.f32 %v419_v7, 0.0  ;;  %657 = vmatprep.subr.bf16.mxu0 %v692_v47 }
  0xb3   :  { %446 = vadd.xlane.f32.xlu1 %v445_v46  ;;  %v493_v20 = vadd.s32 4294967288, %v488_v17  ;;  %v500_v23 = vadd.s32 4294967280, %v488_v17  ;;  %v507_v9 = vadd.s32 4294967272, %v488_v17  ;;  %v491_v26 = vsub.s32 %v488_v17, %v787_v22 }
  0xb4   :  { %452 = vadd.xlane.f32.xlu0 %v451_v51  ;;  %v457_v0 = vadd.f32 %v435_v63, %v434_v53 }
  0xb5   :  { %659 = vmatpush3.bf16.msra.mxu0 %v658_v4  ;;  %v496_v24 = vsub.s32 %v493_v20, %v787_v22  ;;  %v503_v57 = vsub.s32 %v500_v23, %v787_v22  ;;  %v510_v21 = vsub.s32 %v507_v9, %v787_v22 }
  0xb8   :  { %455 = vadd.xlane.f32.xlu0 %v454_v50 }
  0xbc   :  { %458 = vadd.xlane.f32.xlu0 %v457_v0 }
 0x138   :  { %v441_v59 = vpop.xlane.xlu1 %440 }
 0x139   :  { %v438_v16 = vpop.xlane.xlu0 %437  ;;  %v461_v25 = vmul.f32 0.00390625, %v441_v59 }
 0x13a   :  { %v460_v28 = vmul.f32 0.00390625, %v438_v16 }
 0x13b   :  { %v497_v35 = vrot.slane %v461_v25, %v496_v24 }
 0x13c   :  { %v444_v18 = vpop.xlane.xlu1 %443  ;;  %v492_v37 = vrot.slane %v460_v28, %v491_v26 }
 0x13d   :  { %v450_v19 = vpop.xlane.xlu0 %449  ;;  %v462_v31 = vmul.f32 0.00390625, %v444_v18 }
 0x13e   :  { %v464_v27 = vmul.f32 0.00390625, %v450_v19  ;;  %v499_v3 = vsel %vm498_vm1, %v497_v35, %v492_v37 }
 0x13f   :  { %v504_v39 = vrot.slane %v462_v31, %v503_v57 }
 0x140   :  { %v447_v10 = vpop.xlane.xlu1 %446  ;;  %v517_v42 = vrot.slane %v464_v27, %v491_v26 }
 0x141   :  { %v453_v8 = vpop.xlane.xlu0 %452  ;;  %v463_v32 = vmul.f32 0.00390625, %v447_v10  ;;  %v506_v12 = vsel %vm505_vm2, %v504_v39, %v499_v3 }
 0x142   :  { %v465_v30 = vmul.f32 0.00390625, %v453_v8 }
 0x143   :  { %v511_v43 = vrot.slane %v463_v32, %v510_v21 }
 0x144   :  { %v521_v38 = vrot.slane %v465_v30, %v496_v24 }
 0x145   :  { %v456_v60 = vpop.xlane.xlu0 %455  ;;  %v513_v13 = vsel %vm512_vm3, %v511_v43, %v506_v12 }
 0x146   :  { %v466_v29 = vmul.f32 0.00390625, %v456_v60  ;;  %v522_v5 = vsel %vm498_vm1, %v521_v38, %v517_v42 }
 0x148   :  { %v526_v40 = vrot.slane %v466_v29, %v503_v57 }
 0x149   :  { %v459_v41 = vpop.xlane.xlu0 %458 }
 0x14a   :  { %v467_v44 = vmul.f32 0.00390625, %v459_v41  ;;  %v527_v22 = vsel %vm505_vm2, %v526_v40, %v522_v5 }
 0x14c   :  { %v531_v45 = vrot.slane %v467_v44, %v510_v21 }
 0x14e   :  { %v532_v58 = vsel %vm512_vm3, %v531_v45, %v527_v22 }
 0x14f   :  { %v534_v15 = vsel %vm533_vm4, %v532_v58, %v513_v13 }
 0x150   :  { %652 = vmatmul.mubr.msk.f32.vlgmr.msra.gmra.mrb[0].mxu0 %vm535_vm5, %v534_v15 }
 0x223   :  { %v604_v55 = vpop.f32.mrb[0].mxu0 }
 0x224   :  { %v605_v48 = vadd.f32 %v636_v54, %v604_v55  ;;  %v653_v49 = vpop.f32.mrb[1].mxu0 }
 0x226   :  { %609 = vst.msk [vmem:[#allocation2] sm:$0x3] %vm608_vm6, %v605_v48 }
 0x227   :  { %678 = shalt.err (!%p675_p4)
}
 0x228   :  { %s679_s2 = scalar_lea.hbm %s924_s5, 32 }
 0x229   :  { %p680_p5 = scmp.ne.s32.totalorder %s924_s5, %s679_s2  ;;  %p683_p6 = scmp.lt.u32.totalorder %s679_s2, %s924_s5 }
 0x22b   :  { %p685_p7 = pnand %p683_p6, %p680_p5 }
 0x22d   :  { %688 = shalt.err (!%p685_p7)
}
 0x22e   :  { %619 = dma.vmem_to_hbm [thread:$0]  %s617_s19, 32, %s924_s5, [#allocation3]  }
 0x22f   :  { %689 = dma.done.wait [#allocation3], 32  }
 0x230   :  { %690 = vsyncadd [#allocation3], 4294967264 }
 0x231   :  { %623 = vsyncpa [#allocation3], 1 }

</bundles_post_ra>
